<compile_context>
chip_gen: v6e
topology: v6e:2x2x1
jax: 0.10.0
libtpu: 0.0.40
codegen_flags: <defaults>
</compile_context>

<pallas_src>
import functools

import jax
import jax.numpy as jnp
from jax.experimental import pallas as pl
from jax.experimental.pallas import tpu as pltpu

TB = 512  # batch tile: lanes per grid step (multiple of 128; h=[32,TB] f32 = 16 vregs)


def mlp_kernel(x_ref, p_ref, o_ref, *, num_inputs, num_outputs):
    """x_ref: [num_inputs, tb], p_ref: [H, num_inputs + 1 + 2*num_outputs],
    o_ref: [num_outputs, tb].  Param slab columns: w1 | b1 | w2^T | b2(row 0)."""
    ni, no = num_inputs, num_outputs
    p = p_ref[...]                      # tiny resident slab, load once
    x = x_ref[...]                      # [ni, tb]  (batch on the lane axis)

    # ---- linear1 + bias on the VPU (K = num_inputs is tiny; MXU skipped on purpose).
    # Column broadcasts happen once per grid step (nothing to re-broadcast per chunk).
    h = p[:, ni:ni + 1]                 # b1 as [H, 1]
    for k in range(ni):                 # static unroll (ni == 2)
        h = h + p[:, k:k + 1] * x[k:k + 1, :]        # [H,1]*[1,tb] -> [H,tb]

    # ---- tanh on the EUP, exact f32 ----
    # TODO(synk): at very large batch on v6e/v7x the single EUP doing H tanh/sample is
    # the saturating unit; a division-free VPU tanh (or bf16 tanh) would lift that
    # ceiling but breaks exact f32 parity with nn.Tanh, so keep exact f32 here.
    h = jnp.tanh(h)

    # ---- linear2 + bias: per-output cross-sublane reduce on the XLU ----
    rows = []
    for o in range(no):                 # static unroll (no == 1)
        w2_o = p[:, ni + 1 + o:ni + 2 + o]                    # [H, 1]
        b2_o = p[0:1, ni + 1 + no + o:ni + 2 + no + o]        # [1, 1]
        rows.append(jnp.sum(w2_o * h, axis=0, keepdims=True) + b2_o)
    y = rows[0] if no == 1 else jnp.concatenate(rows, axis=0)  # [no, tb]

    o_ref[...] = y.astype(o_ref.dtype)


def pack_params(w1, b1, w2, b2):
    """Pack PyTorch-layout params (w1:[H,In], b1:[H], w2:[Out,H], b2:[Out]) into one
    [H, In + 1 + 2*Out] slab.  Done once, OUTSIDE the per-call hot path."""
    num_hidden, _ = w1.shape
    num_outputs = w2.shape[0]
    b2_cols = jnp.zeros((num_hidden, num_outputs), w1.dtype).at[0, :].set(b2)
    return jnp.concatenate([w1, b1[:, None], w2.T.astype(w1.dtype), b2_cols], axis=1)


@jax.jit
def simple_classifier_fwd(x, packed):
    """Forward pass matching the PyTorch module: x [B, num_inputs] -> [B, num_outputs]."""
    batch, num_inputs = x.shape
    num_hidden, width = packed.shape
    num_outputs = (width - num_inputs - 1) // 2

    # Batch on the lane axis (features-major). No full-batch pad: Pallas masks the
    # ragged last tile in-kernel; only batches below one 128-lane tile get padded.
    tb = min(TB, pl.cdiv(batch, 128) * 128)
    x_t = x.T                                              # [num_inputs, batch]
    lanes = batch
    if batch < tb:
        x_t = jnp.pad(x_t, ((0, 0), (0, tb - batch)))
        lanes = tb

    kernel = functools.partial(
        mlp_kernel, num_inputs=num_inputs, num_outputs=num_outputs)

    out_t = pl.pallas_call(
        kernel,
        out_shape=jax.ShapeDtypeStruct((num_outputs, lanes), x.dtype),
        grid=(pl.cdiv(lanes, tb),),
        in_specs=[
            pl.BlockSpec((num_inputs, tb), lambda i: (0, i)),     # lane-dense batch tile
            pl.BlockSpec((num_hidden, width), lambda i: (0, 0)),  # resident param slab
        ],
        out_specs=pl.BlockSpec((num_outputs, tb), lambda i: (0, i)),  # lane-dense stores
        compiler_params=pltpu.CompilerParams(
            dimension_semantics=("parallel",)),                   # megacore split on v7x
    )(x_t, packed)

    return out_t[:, :batch].T                                     # [B, num_outputs]


if __name__ == "__main__":
    # XOR classifier sizes: num_inputs=2, num_hidden=32, num_outputs=1.
    num_inputs, num_hidden, num_outputs = 2, 32, 1

    key = jax.random.PRNGKey(0)
    kx, kw1, kb1, kw2, kb2 = jax.random.split(key, 5)

    # Deterministic param init (Kaiming-uniform-ish bounds like nn.Linear defaults).
    bound1 = 1.0 / (num_inputs ** 0.5)
    w1 = jax.random.uniform(kw1, (num_hidden, num_inputs), jnp.float32, -bound1, bound1)
    b1 = jax.random.uniform(kb1, (num_hidden,), jnp.float32, -bound1, bound1)
    bound2 = 1.0 / (num_hidden ** 0.5)
    w2 = jax.random.uniform(kw2, (num_outputs, num_hidden), jnp.float32, -bound2, bound2)
    b2 = jax.random.uniform(kb2, (num_outputs,), jnp.float32, -bound2, bound2)

    packed = pack_params(w1, b1, w2, b2)   # one-time packing, not in the hot path

    def ref_fwd(xx):
        return jnp.tanh(xx @ w1.T + b1) @ w2.T + b2

    # Main check: batch=1000 -> 2 grid steps (megacore-splittable) with the ragged
    # last tile handled by Pallas masking (no wrapper-side pad).
    x = jax.random.normal(kx, (1000, num_inputs), dtype=jnp.float32)
    out = jax.block_until_ready(simple_classifier_fwd(x, packed))
    ref = ref_fwd(x)
    assert out.shape == (1000, num_outputs)
    assert jnp.allclose(out, ref, atol=1e-5, rtol=1e-5), float(jnp.max(jnp.abs(out - ref)))

    # Tiny-batch path (smaller than one 128-lane tile) still works.
    x_small = jax.random.normal(kx, (5, num_inputs), dtype=jnp.float32)
    out_small = jax.block_until_ready(simple_classifier_fwd(x_small, packed))
    ref_small = ref_fwd(x_small)
    assert out_small.shape == (5, num_outputs)
    assert jnp.allclose(out_small, ref_small, atol=1e-5, rtol=1e-5)

    print("KERNEL_OK")
</pallas_src>

<mosaic_0001>
module attributes {stable_mosaic.version = 11 : i64} {
  func.func @mlp_kernel(%arg0: i32, %arg1: memref<2x512xf32, #tpu.memory_space<vmem>>, %arg2: memref<32x5xf32, #tpu.memory_space<vmem>>, %arg3: memref<1x512xf32, #tpu.memory_space<vmem>>) attributes {dimension_semantics = [#tpu.dimension_semantics<parallel>], iteration_bounds = array<i64: 2>, scalar_prefetch = 0 : i64, scratch_operands = 0 : i64, tpu.core_type = #tpu.core_type<tc>, window_params = [{transform_indices = @transform_0, window_bounds = array<i64: 2, 512>}, {pipeline_mode = #tpu.pipeline_mode<synchronous>, transform_indices = @transform_1, window_bounds = array<i64: 32, 5>}, {transform_indices = @transform_2, window_bounds = array<i64: 1, 512>}]} {
    %c0 = arith.constant 0 : index
    %c0_0 = arith.constant 0 : index
    %0 = vector.load %arg2[%c0, %c0_0] : memref<32x5xf32, #tpu.memory_space<vmem>>, vector<32x5xf32>
    %c0_1 = arith.constant 0 : index
    %c0_2 = arith.constant 0 : index
    %1 = vector.load %arg1[%c0_1, %c0_2] : memref<2x512xf32, #tpu.memory_space<vmem>>, vector<2x512xf32>
    %2 = vector.extract_strided_slice %0 {offsets = [0, 2], sizes = [32, 1], strides = [1, 1]} : vector<32x5xf32> to vector<32x1xf32>
    %3 = vector.extract_strided_slice %0 {offsets = [0, 0], sizes = [32, 1], strides = [1, 1]} : vector<32x5xf32> to vector<32x1xf32>
    %4 = vector.extract_strided_slice %1 {offsets = [0, 0], sizes = [1, 512], strides = [1, 1]} : vector<2x512xf32> to vector<1x512xf32>
    %5 = vector.broadcast %3 : vector<32x1xf32> to vector<32x512xf32>
    %6 = vector.broadcast %4 : vector<1x512xf32> to vector<32x512xf32>
    %7 = arith.mulf %5, %6 : vector<32x512xf32>
    %8 = vector.broadcast %2 : vector<32x1xf32> to vector<32x512xf32>
    %9 = arith.addf %8, %7 : vector<32x512xf32>
    %10 = vector.extract_strided_slice %0 {offsets = [0, 1], sizes = [32, 1], strides = [1, 1]} : vector<32x5xf32> to vector<32x1xf32>
    %11 = vector.extract_strided_slice %1 {offsets = [1, 0], sizes = [1, 512], strides = [1, 1]} : vector<2x512xf32> to vector<1x512xf32>
    %12 = vector.broadcast %10 : vector<32x1xf32> to vector<32x512xf32>
    %13 = vector.broadcast %11 : vector<1x512xf32> to vector<32x512xf32>
    %14 = arith.mulf %12, %13 : vector<32x512xf32>
    %15 = arith.addf %9, %14 : vector<32x512xf32>
    %16 = math.tanh %15 : vector<32x512xf32>
    %17 = vector.extract_strided_slice %0 {offsets = [0, 3], sizes = [32, 1], strides = [1, 1]} : vector<32x5xf32> to vector<32x1xf32>
    %18 = vector.extract_strided_slice %0 {offsets = [0, 4], sizes = [1, 1], strides = [1, 1]} : vector<32x5xf32> to vector<1x1xf32>
    %19 = vector.broadcast %17 : vector<32x1xf32> to vector<32x512xf32>
    %20 = arith.mulf %19, %16 : vector<32x512xf32>
    %cst = arith.constant dense<0.000000e+00> : vector<512xf32>
    %21 = vector.multi_reduction <add>, %20, %cst [0] : vector<32x512xf32> to vector<512xf32>
    %22 = vector.shape_cast %21 : vector<512xf32> to vector<1x512xf32>
    %23 = vector.broadcast %18 : vector<1x1xf32> to vector<1x512xf32>
    %24 = arith.addf %22, %23 : vector<1x512xf32>
    %c0_3 = arith.constant 0 : index
    %c0_4 = arith.constant 0 : index
    %25 = vector.load %arg3[%c0_3, %c0_4] : memref<1x512xf32, #tpu.memory_space<vmem>>, vector<1x512xf32>
    tpu.vector_store %arg3[%c0_3, %c0_4], %24 {strides = array<i32>} : memref<1x512xf32, #tpu.memory_space<vmem>>, vector<1x512xf32>,
    return
  }
  func.func @transform_0(%arg0: i32) -> (i32, i32) {
    %c0_i32 = arith.constant 0 : i32
    %c0_i32_0 = arith.constant 0 : i32
    return %c0_i32, %arg0 : i32, i32
  }
  func.func @transform_1(%arg0: i32) -> (i32, i32) {
    %c0_i32 = arith.constant 0 : i32
    %c0_i32_0 = arith.constant 0 : i32
    %c0_i32_1 = arith.constant 0 : i32
    return %c0_i32, %c0_i32_0 : i32, i32
  }
  func.func @transform_2(%arg0: i32) -> (i32, i32) {
    %c0_i32 = arith.constant 0 : i32
    %c0_i32_0 = arith.constant 0 : i32
    return %c0_i32, %arg0 : i32, i32
  }
}

</mosaic_0001>

<bundles_post_ra>
// kernel: simple_classifier_fwd.1
= control target key start
LH: loop header
LB: loop body
LE: loop exit
PB: predicated region body
PF: predicated region fallthrough
CT: control target
= control target key end

     0   :  { %7 = vsyncpa [#allocation3], 0  ;;  %s870_s0 = inlined_call_operand.vmem [shape: f32[2,1000], index: 0, kind: input, shape index: {}]   ;;  %s871_s1 = inlined_call_operand.vmem [shape: f32[32,5], index: 1, kind: input, shape index: {}]   ;;  %s872_s2 = inlined_call_operand.hbm [shape: f32[1,1000], index: 2, kind: output, shape index: {}]  }
   0x1   :  { %9 = vsyncpa [#allocation3 + $0x1], 0  ;;  %s723_s9 = smov 0   ;;  %s725_s10 = smov 0  }
   0x2   :  { %s727_s11 = smov 0   ;;  %s729_s12 = smov 0  }
   0x3 LB: > { %s744_s13 = sadd.s32 4294967295, %s699_s12   ;;  %s539_s14 = sadd.s32 4294967294, %s699_s12   ;;  %s699_s12 = sphi %s729_s12, %s878_s12   ;;  %s695_s11 = sphi %s727_s11, %s877_s11   ;;  %s691_s10 = sphi %s725_s10, %s876_s10   ;;  %s687_s9 = sphi %s723_s9, %s875_s9  }
   0x4   : > { %s748_s15 = sadd.s32 1, %s699_s12   ;;  %s69_s16 = sadd.s32 1, %s695_s11 }
   0x5   : > { %s66_s17 = ssub.s32 %s699_s12, %s748_s15  ;;  %p79_p0 = scmp.ne.s32.totalorder %s695_s11, %s691_s10 }
   0x6   : > { %p67_p1 = scmp.eq.s32.totalorder %s66_s17, 0  ;;  %p80_p2 = scmp.eq.s32.totalorder %s744_s13, 1 }
   0x7   : > { %p85_p3 = scmp.ne.s32.totalorder %s691_s10, %s687_s9  ;;  %p86_p4 = scmp.eq.s32.totalorder %s539_s14, 1 }
   0x8   : > { %s759_s18 = scalar_select %p67_p1, %s695_s11, %s69_s16  }
   0x9   : > { %p761_p5 = por %p80_p2, %p79_p0  ;;  %p765_p6 = por %p86_p4, %p85_p3 }
   0xa   : > { %p542_p7 = scmp.ge.s32.totalorder %s699_s12, 1  ;;  %p116_p8 = scmp.lt.s32.totalorder %s699_s12, 3 }
   0xc   : > { %p117_p9 = pnand %p542_p7, %p116_p8 }
   0xd   : > { %s544_s29 = sshll.u32 (!%p117_p9), %s744_s13, 2  ;;  %s135_s6 = sand.u32 (!%p117_p9), 1, %s691_s10  }
   0xe   : > { %120 = sbr.rel (%p117_p9) target bundleno = 233 (0xe9), region = 28  ;;  %p139_p10 = scmp.lt.s32.totalorder (!%p117_p9), %s544_s29, 7 }
   0xf   : > { %s543_s7 = sshll.u32 (!%p117_p9), %s135_s6, 2  ;;  %s551_s8 = sshll.u32 (!%p117_p9), %s744_s13, 6 }
  0x10   : > { %s137_s14 = scalar_lea.vmem (!%p117_p9), [#allocation2], %s543_s7  ;;  %s478_s22 = scalar_lea.hbm (!%p117_p9), %s872_s2, %s551_s8 }
  0x11   : > { %s480_s16 = sshll.u32 (!%p117_p9), %s137_s14, 4  ;;  %s466_s23 = scalar_lea.sflag (!%p117_p9), [#allocation3], %s135_s6  ;;  %s481_s16 = int_to_ptr.vmem [resolvable:$true] %s480_s16 }
  0x12   : > { %s639_s24 = scalar_lea.vmem (!%p117_p9), %s481_s16, 64  ;;  %s707_s25 = smov (!%p117_p9), [#allocation2]  }
  0x13   : > { %v147_v0 = vld [vmem:[%s871_s1 + $0x10] sm:$0xff]  ;;  %v145_v1 = vld [vmem:[%s871_s1] sm:$0xff]  ;;  %v701_v2 = vmov 0   ;;  %v146_v3 = vld [vmem:[%s871_s1 + $0x8] sm:$0xff]  ;;  %v702_v4 = vmov 2   ;;  %v703_v6 = vmov 1   ;;  %v171_v9 = vlaneseq  ;;  %p640_p11 = scmp.ne.s32.totalorder %s481_s16, %s639_s24 }
  0x14   : > { %598 = vset.pattern.permute.xlu1 %v701_v2  ;;  %597 = vset.pattern.permute.xlu0 %v701_v2  ;;  %v148_v5 = vld [vmem:[%s871_s1 + $0x18] sm:$0xff]  ;;  %v704_v7 = vmov 3   ;;  %v705_v8 = vmov 4   ;;  %s880_s29 = smov (!%p139_p10, %s544_s29), 7  ;;  %s643_s13 = sshll.u32 %s707_s25, 4  ;;  %s644_s13 = int_to_ptr.vmem [resolvable:$false] %s643_s13 }
  0x15   : > { %162 = vperm.xlu1 %598, %v147_v0   ;;  %152 = vperm.xlu0 %597, %v145_v1   ;;  %s545_s30 = sshll.u32 %s880_s29, 1  ;;  %v785_v10 = vshrl.u32 %v171_v9, 7  ;;  %vm462_vm0 = vcmp.lt.s32.totalorder %v171_v9, 512  ;;  %p641_p12 = pnand %p640_p11, %p761_p5 }
  0x16   : > { %s142_s5 = scalar_lea.vmem %s870_s0, %s545_s30  ;;  %s645_s26 = scalar_lea.vmem %s644_s13, 128 }
  0x17   : > { %v173_v11 = vsub.s32 0, %v785_v10  ;;  %v273_v14 = vsub.s32 1, %v785_v10  ;;  %v177_v15 = vsub.s32 2, %v785_v10  ;;  %v181_v16 = vsub.s32 4, %v785_v10  ;;  %v149_v17 = vld [vmem:[%s142_s5] sm:$0xff]  ;;  %p642_p13 = pneg %p641_p12  ;;  %p646_p0 = scmp.lt.s32.totalorder %s481_s16, %s644_s13 }
  0x18   : > { %v277_v18 = vsub.s32 3, %v785_v10  ;;  %v185_v19 = vsub.s32 6, %v785_v10  ;;  %v281_v20 = vsub.s32 5, %v785_v10  ;;  %v285_v21 = vsub.s32 7, %v785_v10  ;;  %p647_p1 = scmp.lt.s32.totalorder %s645_s26, %s639_s24 }
  0x19   : > { %599 = vset.pattern.permute.xlu1 %v702_v4  ;;  %157 = vperm.xlu0 %597, %v146_v3   ;;  %v174_v22 = vrot.slane %v149_v17, %v173_v11  ;;  %v274_v24 = vrot.slane %v149_v17, %v273_v14  ;;  %v178_v25 = vrot.slane %v149_v17, %v177_v15 }
  0x1a   : > { %224 = vperm.xlu1 %599, %v145_v1   ;;  %v182_v26 = vrot.slane %v149_v17, %v181_v16  ;;  %v278_v28 = vrot.slane %v149_v17, %v277_v18  ;;  %v186_v29 = vrot.slane %v149_v17, %v185_v19  ;;  %v282_v30 = vrot.slane %v149_v17, %v281_v20  ;;  %p648_p2 = por %p647_p1, %p646_p0 }
  0x1b   : > { %v286_v31 = vrot.slane %v149_v17, %v285_v21  ;;  %v194_v32 = vrot.slane %v174_v22, %v173_v11  ;;  %v802_v34 = vrot.slane %v274_v24, %v273_v14  ;;  %v198_v35 = vrot.slane %v178_v25, %v173_v11 }
  0x1c   : > { %v202_v36 = vrot.slane %v182_v26, %v173_v11  ;;  %v804_v37 = vrot.slane %v278_v28, %v273_v14  ;;  %v206_v38 = vrot.slane %v186_v29, %v173_v11  ;;  %v806_v41 = vrot.slane %v282_v30, %v273_v14  ;;  %p649_p3 = pnand %p648_p2, %p642_p13 }
  0x1d   : > { %167 = vperm.xlu0 %597, %v148_v5   ;;  %v808_v42 = vrot.slane %v286_v31, %v273_v14 }
  0x1e   : > { %600 = vset.pattern.permute.xlu1 %v703_v6 }
  0x1f   : > { %256 = vperm.xlu1 %600, %v145_v1  }
  0x21   : > { %601 = vset.pattern.permute.xlu0 %v702_v4 }
  0x22   : > { %228 = vperm.xlu0 %601, %v146_v3  }
  0x23   : > { %260 = vperm.xlu1 %600, %v146_v3  }
  0x26   : > { %236 = vperm.xlu0 %601, %v148_v5  }
  0x27   : > { %602 = vset.pattern.permute.xlu1 %v702_v4 }
  0x28   : > { %232 = vperm.xlu1 %602, %v147_v0  }
  0x2a   : > { %605 = vset.pattern.permute.xlu0 %v704_v7 }
  0x2b   : > { %360 = vperm.xlu0 %605, %v146_v3  }
  0x2c   : > { %603 = vset.pattern.permute.xlu1 %v703_v6 }
  0x2d   : > { %264 = vperm.xlu1 %603, %v147_v0  }
  0x2f   : > { %606 = vset.pattern.permute.xlu0 %v705_v8 }
  0x30   : > { %424 = vperm.xlu0 %606, %v145_v1  }
  0x31   : > { %268 = vperm.xlu1 %603, %v148_v5  }
  0x35   : > { %604 = vset.pattern.permute.xlu1 %v704_v7 }
  0x36   : > { %356 = vperm.xlu1 %604, %v145_v1  }
  0x3a   : > { %364 = vperm.xlu1 %604, %v147_v0  }
  0x3e   : > { %368 = vperm.xlu1 %604, %v148_v5  }
  0x90   : > { %v791_v12 = vpop.permute.xlu1 %162  ;;  %v153_v13 = vpop.permute.xlu0 %152 }
  0x91   : > { %v207_v39 = vmul.f32 %v194_v32, %v153_v13  ;;  %v208_v43 = vmul.f32 %v198_v35, %v153_v13  ;;  %v209_v44 = vmul.f32 %v202_v36, %v153_v13  ;;  %v210_v45 = vmul.f32 %v206_v38, %v153_v13 }
  0x92   : > { %v215_v11 = vmul.f32 %v194_v32, %v791_v12  ;;  %v216_v14 = vmul.f32 %v198_v35, %v791_v12  ;;  %v217_v15 = vmul.f32 %v202_v36, %v791_v12  ;;  %v218_v16 = vmul.f32 %v206_v38, %v791_v12 }
  0x94   : > { %v158_v23 = vpop.permute.xlu0 %157 }
  0x95   : > { %v225_v27 = vpop.permute.xlu1 %224  ;;  %v211_v46 = vmul.f32 %v194_v32, %v158_v23  ;;  %v212_v51 = vmul.f32 %v198_v35, %v158_v23  ;;  %v213_v57 = vmul.f32 %v202_v36, %v158_v23  ;;  %v214_v58 = vmul.f32 %v206_v38, %v158_v23 }
  0x96   : > { %v239_v50 = vadd.f32 %v225_v27, %v207_v39  ;;  %v240_v55 = vadd.f32 %v225_v27, %v208_v43  ;;  %v241_v56 = vadd.f32 %v225_v27, %v209_v44  ;;  %v242_v59 = vadd.f32 %v225_v27, %v210_v45 }
  0x98   : > { %v800_v33 = vpop.permute.xlu0 %167 }
  0x99   : > { %v219_v17 = vmul.f32 %v194_v32, %v800_v33  ;;  %v220_v18 = vmul.f32 %v198_v35, %v800_v33  ;;  %v221_v20 = vmul.f32 %v202_v36, %v800_v33  ;;  %v222_v31 = vmul.f32 %v206_v38, %v800_v33 }
  0x9a   : > { %v257_v40 = vpop.permute.xlu1 %256 }
  0x9b   : > { %v307_v47 = vmul.f32 %v802_v34, %v257_v40  ;;  %v308_v48 = vmul.f32 %v804_v37, %v257_v40  ;;  %v309_v52 = vmul.f32 %v806_v41, %v257_v40  ;;  %v310_v53 = vmul.f32 %v808_v42, %v257_v40 }
  0x9d   : > { %v229_v49 = vpop.permute.xlu0 %228  ;;  %v323_v60 = vadd.f32 %v307_v47, %v239_v50  ;;  %v324_v63 = vadd.f32 %v308_v48, %v240_v55  ;;  %v325_v0 = vadd.f32 %v309_v52, %v241_v56  ;;  %v326_v1 = vadd.f32 %v310_v53, %v242_v59 }
  0x9e   : > { %v261_v54 = vpop.permute.xlu1 %260  ;;  %v243_v61 = vadd.f32 %v229_v49, %v211_v46  ;;  %v244_v2 = vadd.f32 %v229_v49, %v212_v51  ;;  %v245_v4 = vadd.f32 %v229_v49, %v213_v57  ;;  %v246_v5 = vadd.f32 %v229_v49, %v214_v58 }
  0x9f   : > { %v311_v62 = vmul.f32 %v802_v34, %v261_v54  ;;  %v312_v3 = vmul.f32 %v804_v37, %v261_v54  ;;  %v313_v6 = vmul.f32 %v806_v41, %v261_v54  ;;  %v314_v7 = vmul.f32 %v808_v42, %v261_v54 }
  0xa0   : > { %607 = vtanh.f32 %v323_v60 }
  0xa1   : > { %v327_v13 = vadd.f32 %v311_v62, %v243_v61  ;;  %609 = vtanh.f32 %v324_v63  ;;  %v328_v19 = vadd.f32 %v312_v3, %v244_v2  ;;  %v329_v21 = vadd.f32 %v313_v6, %v245_v4  ;;  %v237_v23 = vpop.permute.xlu0 %236 }
  0xa2   : > { %611 = vtanh.f32 %v325_v0  ;;  %v330_v22 = vadd.f32 %v314_v7, %v246_v5  ;;  %v251_v32 = vadd.f32 %v237_v23, %v219_v17  ;;  %v252_v43 = vadd.f32 %v237_v23, %v220_v18 }
  0xa3   : > { %v233_v8 = vpop.permute.xlu1 %232  ;;  %613 = vtanh.f32 %v326_v1  ;;  %v253_v44 = vadd.f32 %v237_v23, %v221_v20  ;;  %v254_v33 = vadd.f32 %v237_v23, %v222_v31 }
  0xa4   : > { %615 = vtanh.f32 %v327_v13  ;;  %v247_v24 = vadd.f32 %v233_v8, %v215_v11  ;;  %v248_v25 = vadd.f32 %v233_v8, %v216_v14  ;;  %v249_v26 = vadd.f32 %v233_v8, %v217_v15 }
  0xa5   : > { %617 = vtanh.f32 %v328_v19  ;;  %v250_v35 = vadd.f32 %v233_v8, %v218_v16 }
  0xa6   : > { %619 = vtanh.f32 %v329_v21  ;;  %v361_v57 = vpop.permute.xlu0 %360 }
  0xa7   : > { %621 = vtanh.f32 %v330_v22 }
  0xa8   : > { %v265_v27 = vpop.permute.xlu1 %264 }
  0xa9   : > { %v315_v12 = vmul.f32 %v802_v34, %v265_v27  ;;  %v316_v28 = vmul.f32 %v804_v37, %v265_v27  ;;  %v317_v29 = vmul.f32 %v806_v41, %v265_v27  ;;  %v318_v30 = vmul.f32 %v808_v42, %v265_v27 }
  0xab   : > { %v331_v36 = vadd.f32 %v315_v12, %v247_v24  ;;  %v332_v39 = vadd.f32 %v316_v28, %v248_v25  ;;  %v333_v40 = vadd.f32 %v317_v29, %v249_v26  ;;  %v334_v45 = vadd.f32 %v318_v30, %v250_v35 }
  0xac   : > { %v269_v46 = vpop.permute.xlu1 %268 }
  0xad   : > { %623 = vtanh.f32 %v331_v36  ;;  %v319_v47 = vmul.f32 %v802_v34, %v269_v46  ;;  %v320_v48 = vmul.f32 %v804_v37, %v269_v46  ;;  %v321_v49 = vmul.f32 %v806_v41, %v269_v46  ;;  %v608_v54 = vpop.eup %607 }
  0xae   : > { %625 = vtanh.f32 %v332_v39  ;;  %v322_v38 = vmul.f32 %v808_v42, %v269_v46  ;;  %v610_v55 = vpop.eup %609 }
  0xaf   : > { %627 = vtanh.f32 %v333_v40  ;;  %v335_v50 = vadd.f32 %v319_v47, %v251_v32  ;;  %v336_v51 = vadd.f32 %v320_v48, %v252_v43  ;;  %v337_v52 = vadd.f32 %v321_v49, %v253_v44  ;;  %v612_v34 = vpop.eup %611 }
  0xb0   : > { %629 = vtanh.f32 %v334_v45  ;;  %v338_v53 = vadd.f32 %v322_v38, %v254_v33  ;;  %v614_v37 = vpop.eup %613  ;;  %v706_v38 = vmov 1966171168  }
  0xb1   : > { %631 = vtanh.f32 %v335_v50  ;;  %v357_v56 = vpop.permute.xlu1 %356  ;;  %v616_v41 = vpop.eup %615  ;;  %v438_v50 = vunpack.c.l.s4 %v706_v38 }
  0xb2   : > { %633 = vtanh.f32 %v336_v51  ;;  %v618_v58 = vpop.eup %617  ;;  %v375_v61 = vmul.f32 %v616_v41, %v361_v57  ;;  %v371_v62 = vmul.f32 %v608_v54, %v357_v56  ;;  %v372_v1 = vmul.f32 %v610_v55, %v357_v56  ;;  %v425_v41 = vpop.permute.xlu0 %424 }
  0xb3   : > { %635 = vtanh.f32 %v337_v52  ;;  %v620_v59 = vpop.eup %619  ;;  %v376_v0 = vmul.f32 %v618_v58, %v361_v57  ;;  %v373_v4 = vmul.f32 %v612_v34, %v357_v56  ;;  %v374_v8 = vmul.f32 %v614_v37, %v357_v56 }
  0xb4   : > { %637 = vtanh.f32 %v338_v53  ;;  %v622_v60 = vpop.eup %621  ;;  %v377_v3 = vmul.f32 %v620_v59, %v361_v57  ;;  %v387_v14 = vadd.f32 %v375_v61, %v371_v62  ;;  %v439_v37 = vunpack.c.0.s8 %v438_v50 }
  0xb5   : > { %v365_v42 = vpop.permute.xlu1 %364  ;;  %v378_v7 = vmul.f32 %v622_v60, %v361_v57  ;;  %v396_v17 = vadd.f32 %v376_v0, %v372_v1 }
  0xb6   : > { %v405_v21 = vadd.f32 %v377_v3, %v373_v4  ;;  %v442_v0 = vsub.s32 %v439_v37, %v785_v10 }
  0xb7   : > { %v414_v25 = vadd.f32 %v378_v7, %v374_v8 }
  0xb9   : > { %v369_v19 = vpop.permute.xlu1 %368 }
  0xba   : > { %v624_v63 = vpop.eup %623 }
  0xbb   : > { %v626_v2 = vpop.eup %625  ;;  %v379_v5 = vmul.f32 %v624_v63, %v365_v42 }
  0xbc   : > { %v628_v6 = vpop.eup %627  ;;  %v380_v11 = vmul.f32 %v626_v2, %v365_v42 }
  0xbd   : > { %v630_v13 = vpop.eup %629  ;;  %v381_v15 = vmul.f32 %v628_v6, %v365_v42  ;;  %v388_v23 = vadd.f32 %v387_v14, %v379_v5 }
  0xbe   : > { %v632_v16 = vpop.eup %631  ;;  %v382_v18 = vmul.f32 %v630_v13, %v365_v42  ;;  %v397_v27 = vadd.f32 %v396_v17, %v380_v11 }
  0xbf   : > { %v634_v20 = vpop.eup %633  ;;  %v383_v22 = vmul.f32 %v632_v16, %v369_v19  ;;  %v406_v30 = vadd.f32 %v405_v21, %v381_v15 }
  0xc0   : > { %v636_v24 = vpop.eup %635  ;;  %v384_v26 = vmul.f32 %v634_v20, %v369_v19  ;;  %v415_v35 = vadd.f32 %v414_v25, %v382_v18 }
  0xc1   : > { %v638_v12 = vpop.eup %637  ;;  %v385_v28 = vmul.f32 %v636_v24, %v369_v19  ;;  %v389_v29 = vadd.f32 %v388_v23, %v383_v22 }
  0xc2   : > { %v386_v31 = vmul.f32 %v638_v12, %v369_v19  ;;  %v398_v32 = vadd.f32 %v397_v27, %v384_v26 }
  0xc3   : > { %v390_v36 = vrot.slane %v389_v29, 4  ;;  %v407_v39 = vadd.f32 %v406_v30, %v385_v28 }
  0xc4   : > { %v399_v40 = vrot.slane %v398_v32, 4  ;;  %v416_v43 = vadd.f32 %v415_v35, %v386_v31 }
  0xc5   : > { %v391_v44 = vadd.f32 %v390_v36, %v389_v29  ;;  %v408_v45 = vrot.slane %v407_v39, 4 }
  0xc6   : > { %v400_v46 = vadd.f32 %v399_v40, %v398_v32  ;;  %v417_v47 = vrot.slane %v416_v43, 4 }
  0xc7   : > { %v409_v48 = vadd.f32 %v408_v45, %v407_v39  ;;  %v392_v49 = vrot.slane %v391_v44, 2 }
  0xc8   : > { %v418_v33 = vadd.f32 %v417_v47, %v416_v43  ;;  %v401_v51 = vrot.slane %v400_v46, 2 }
  0xc9   : > { %v393_v52 = vadd.f32 %v392_v49, %v391_v44  ;;  %v410_v53 = vrot.slane %v409_v48, 2 }
  0xca   : > { %v402_v54 = vadd.f32 %v401_v51, %v400_v46  ;;  %v419_v55 = vrot.slane %v418_v33, 2 }
  0xcb   : > { %v394_v56 = vrot.slane %v393_v52, 1  ;;  %v411_v34 = vadd.f32 %v410_v53, %v409_v48 }
  0xcc   : > { %v403_v57 = vrot.slane %v402_v54, 1  ;;  %v420_v58 = vadd.f32 %v419_v55, %v418_v33 }
  0xcd   : > { %v395_v59 = vadd.f32 %v394_v56, %v393_v52  ;;  %v412_v42 = vrot.slane %v411_v34, 1 }
  0xce   : > { %v404_v60 = vadd.f32 %v403_v57, %v402_v54  ;;  %v421_v61 = vrot.slane %v420_v58, 1 }
  0xcf   : > { %v413_v62 = vadd.f32 %v412_v42, %v411_v34  ;;  %v427_v63 = vadd.f32 %v425_v41, %v395_v59 }
  0xd0   : > { %v422_v1 = vadd.f32 %v421_v61, %v420_v58  ;;  %v428_v2 = vadd.f32 %v425_v41, %v404_v60 }
  0xd1   : > { %v429_v3 = vadd.f32 %v425_v41, %v413_v62 }
  0xd2   : > { %v430_v4 = vadd.f32 %v425_v41, %v422_v1  ;;  %v435_v5 = vcombine.low %v427_v63, %v428_v2 }
  0xd4   : > { %v436_v6 = vcombine.low %v429_v3, %v430_v4  ;;  %v443_v7 = vrot.slane %v435_v5, %v442_v0 }
  0xd6   : > { %v450_v8 = vrot.slane %v436_v6, %v442_v0 }
  0xd8   : > { %v451_v11 = vcombine.low %v443_v7, %v450_v8 }
  0xda   : > { %v458_v13 = vrot.slane %v451_v11, %v442_v0 }
  0xdc   : > { %464 = vst.msk [vmem:[%s137_s14] sm:$0xf] %vm462_vm0, %v458_v13 }
  0xdd   : > { %652 = shalt.err (!%p649_p3)
}
  0xde   : > { %s653_s27 = scalar_lea.hbm %s478_s22, 64  ;;  %s657_s30 = scalar_lea.hbm %s872_s2, 128 }
  0xdf   : > { %p654_p4 = scmp.ne.s32.totalorder %s478_s22, %s653_s27  ;;  %p658_p9 = scmp.lt.s32.totalorder %s478_s22, %s872_s2 }
  0xe0   : > { %p659_p10 = scmp.lt.s32.totalorder %s657_s30, %s653_s27 }
  0xe1   : > { %p655_p7 = pnand %p654_p4, %p761_p5 }
  0xe2   : > { %p660_p11 = por %p659_p10, %p658_p9 }
  0xe3   : > { %p656_p8 = pneg %p655_p7 }
  0xe5   : > { %p661_p12 = pnand %p660_p11, %p656_p8 }
  0xe7   : > { %664 = shalt.err (!%p661_p12)
}
  0xe8   : > { %552 = dma.vmem_to_hbm [thread:$0]  (%p761_p5), %s481_s16, 64, %s478_s22, %s466_s23  }
  0xe9 PF: > { %p558_p13 = scmp.ge.s32.totalorder %s699_s12, 2  ;;  %s492_s5 = sand.u32 1, %s687_s9  }
  0xea   : > { %s493_s6 = scalar_lea.sflag [#allocation3], %s492_s5 }
  0xeb   : > { %p555_p0 = pnand %p558_p13, %p765_p6 }
  0xed   : > { %p556_p1 = pneg %p555_p0 }
  0xef   : > { %682 = dma.done.wait (%p556_p1), %s493_s6, 64  }
  0xf0   : > { %684 = vsyncadd (%p556_p1), %s493_s6, 4294967232  ;;  %p12_p2 = scmp.ge.s32.totalorder %s748_s15, 4   ;;  %s875_s9 = smov %s691_s10 }
  0xf1   : > { %s876_s10 = smov %s695_s11  ;;  %s877_s11 = smov %s759_s18 }
  0xf2   : > { %s878_s12 = smov %s748_s15  ;;  %14 = sbr.rel (!%p12_p2) target bundleno = 3 (0x3), region = 63 }
  0xf7   :  { %498 = vsyncpa [#allocation3], 1 }
  0xf8   :  { %500 = vsyncpa [#allocation3 + $0x1], 1 }

</bundles_post_ra>
